<compile_context>
chip_gen: v5e
topology: v5e:2x2
jax: 0.10.0
libtpu: 0.0.40
codegen_flags: <defaults>
</compile_context>

<pallas_src>
import numpy as np
import jax
import jax.numpy as jnp
from jax.experimental import pallas as pl
from jax.experimental.pallas import tpu as pltpu


# ---------------------------------------------------------------------------
# Kernel A: im2col matmul conv(k=5) + GroupNorm(1, eps=1e-8) + sigmoid + gate.
# One program per batch element (GroupNorm(1) is per-sample).  Layout:
# channels on sublanes, flattened H*W on lanes.
# ---------------------------------------------------------------------------
def conv_gn_gate_kernel(p_ref, w_ref, b_ref, g_ref, gb_ref, xr_ref, o_ref):
    # p_ref  : (1, K*K*Cin, HW)   im2col patches of the padded input
    # w_ref  : (Cout, K*K*Cin)    conv weight, (kh, kw, cin)-major columns
    # b_ref  : (Cout, 1)          conv bias
    # g_ref  : (Cout, 1)          GroupNorm gamma
    # gb_ref : (Cout, 1)          GroupNorm beta
    # xr_ref : (1, Cout, HW)      gating input x_r
    # o_ref  : (1, Cout, HW)      y = x_r * sigmoid(norm(conv(x)))
    acc = jnp.dot(w_ref[...], p_ref[0], preferred_element_type=jnp.float32)
    acc = acc + b_ref[...]                              # (Cout, HW)

    # GroupNorm with a single group == LayerNorm over (C, H, W), biased var.
    mu = jnp.mean(acc)
    var = jnp.mean((acc - mu) ** 2)
    yn = (acc - mu) * jax.lax.rsqrt(var + 1e-8)
    yn = yn * g_ref[...] + gb_ref[...]

    o_ref[0] = xr_ref[0] * jax.nn.sigmoid(yn)


# ---------------------------------------------------------------------------
# Kernel B1: per-(sample, channel) sum and sum-of-squares of the 1x1-conv
# (C -> 2C) output, accumulated over spatial chunks.  The two conv halves
# (rows [0,C) and [C,2C)) belong to the same upsampled channel, so their
# statistics are pooled.
# ---------------------------------------------------------------------------
def up_stats_kernel(y_ref, w_ref, b_ref, ssum_ref, ssq_ref):
    # y_ref  : (1, C, SC)      gated activation chunk
    # w_ref  : (2C, C)         1x1 conv weight
    # b_ref  : (2C, 1)         1x1 conv bias
    # ssum   : (1, C, 1)       per-channel running sum   (accumulated over chunks)
    # ssq    : (1, C, 1)       per-channel running sumsq (accumulated over chunks)
    C = y_ref.shape[1]

    @pl.when(pl.program_id(1) == 0)
    def _():
        ssum_ref[...] = jnp.zeros_like(ssum_ref)
        ssq_ref[...] = jnp.zeros_like(ssq_ref)

    z = jnp.dot(w_ref[...], y_ref[0], preferred_element_type=jnp.float32)
    z = z + b_ref[...]                                  # (2C, SC)
    z0 = z[:C]
    z1 = z[C:]
    # TODO(synk): single-pass sum-of-squares can lose precision for very large
    # spatial sizes; a Welford / two-pass variant would be more robust.
    ssum_ref[0] += (jnp.sum(z0, axis=1, keepdims=True)
                    + jnp.sum(z1, axis=1, keepdims=True))
    ssq_ref[0] += (jnp.sum(z0 * z0, axis=1, keepdims=True)
                   + jnp.sum(z1 * z1, axis=1, keepdims=True))


# ---------------------------------------------------------------------------
# Kernel B2: recompute the cheap 1x1 conv, apply folded SwitchNorm
# (scale/shift precomputed per sample+channel) and PReLU, emit the even /
# odd width sub-pixel slices as two lane-dense outputs.
# ---------------------------------------------------------------------------
def up_apply_kernel(y_ref, w_ref, b_ref, sc_ref, sh_ref, a_ref, o0_ref, o1_ref):
    # y_ref  : (1, C, SC)
    # w_ref  : (2C, C), b_ref: (2C, 1)
    # sc_ref : (1, 2C, 1)  folded scale  gamma / sqrt(var+eps)
    # sh_ref : (1, 2C, 1)  folded shift  beta - mean*scale
    # a_ref  : (2C, 1)     PReLU per-channel slope (tiled for both halves)
    # o0/o1  : (1, C, SC)  even / odd width sub-pixel slices
    C = y_ref.shape[1]
    z = jnp.dot(w_ref[...], y_ref[0], preferred_element_type=jnp.float32)
    z = z + b_ref[...]                                  # (2C, SC)
    h = z * sc_ref[0] + sh_ref[0]
    h = jnp.where(h >= 0, h, a_ref[...] * h)            # PReLU
    o0_ref[0] = h[:C]
    o1_ref[0] = h[C:]


def _pick_spatial_chunk(hw, target=4096):
    """Largest divisor of hw that is a multiple of 128 and <= target (or hw)."""
    if hw <= target:
        return hw
    c = (target // 128) * 128
    while c >= 128:
        if hw % c == 0:
            return c
        c -= 128
    return hw


# ---------------------------------------------------------------------------
# Wrapper.  Public layout matches PyTorch: NCHW in, NCHW out (no activation
# transposes are needed with the channels-first / HW-on-lane kernel layout).
# ---------------------------------------------------------------------------
@jax.jit
def fc_forward(x_r, x, params):
    N, Cin, H, W = x.shape
    Cout, _, K, _ = params["conv_w"].shape
    P = K // 2
    HW = H * W
    C = Cout

    # ---- im2col in the wrapper: lane-aligned (N, K*K*Cin, H*W) patch slab ----
    # TODO(synk): for very large H*W / Cin, tile Kernel A over H with a (K-1)-row
    # halo instead of a full per-sample im2col slab.
    xp = jnp.pad(x, ((0, 0), (0, 0), (P, P), (P, P)))
    taps = [xp[:, :, kh:kh + H, kw:kw + W] for kh in range(K) for kw in range(K)]
    patches = jnp.concatenate(taps, axis=1).reshape(N, K * K * Cin, HW)
    # weight columns in the same (kh, kw, cin) order
    w2d = jnp.transpose(params["conv_w"], (0, 2, 3, 1)).reshape(Cout, K * K * Cin)
    bc = params["conv_b"].reshape(Cout, 1)
    gw = params["gn_w"].reshape(Cout, 1)
    gb = params["gn_b"].reshape(Cout, 1)
    xr = x_r.reshape(N, Cout, HW)                       # free (no transpose)

    # ---- Kernel A: conv + GroupNorm(1) + sigmoid + gate ----------------------
    y = pl.pallas_call(
        conv_gn_gate_kernel,
        out_shape=jax.ShapeDtypeStruct((N, Cout, HW), jnp.float32),
        grid=(N,),
        in_specs=[
            pl.BlockSpec((1, K * K * Cin, HW), lambda n: (n, 0, 0)),
            pl.BlockSpec((Cout, K * K * Cin), lambda n: (0, 0)),
            pl.BlockSpec((Cout, 1), lambda n: (0, 0)),
            pl.BlockSpec((Cout, 1), lambda n: (0, 0)),
            pl.BlockSpec((Cout, 1), lambda n: (0, 0)),
            pl.BlockSpec((1, Cout, HW), lambda n: (n, 0, 0)),
        ],
        out_specs=pl.BlockSpec((1, Cout, HW), lambda n: (n, 0, 0)),
        compiler_params=pltpu.CompilerParams(dimension_semantics=("parallel",)),
    )(patches, w2d, bc, gw, gb, xr)

    # ---- Kernel B1: tiled per-(sample, channel) statistics -------------------
    SC = _pick_spatial_chunk(HW)
    n_chunks = HW // SC

    w_up = params["up_w"].reshape(2 * C, C)             # (out_ch, in_ch)
    b_up = params["up_b"].reshape(2 * C, 1)

    ssum, ssq = pl.pallas_call(
        up_stats_kernel,
        out_shape=(jax.ShapeDtypeStruct((N, C, 1), jnp.float32),
                   jax.ShapeDtypeStruct((N, C, 1), jnp.float32)),
        grid=(N, n_chunks),
        in_specs=[
            pl.BlockSpec((1, C, SC), lambda n, s: (n, 0, s)),
            pl.BlockSpec((2 * C, C), lambda n, s: (0, 0)),
            pl.BlockSpec((2 * C, 1), lambda n, s: (0, 0)),
        ],
        out_specs=(pl.BlockSpec((1, C, 1), lambda n, s: (n, 0, 0)),
                   pl.BlockSpec((1, C, 1), lambda n, s: (n, 0, 0))),
        compiler_params=pltpu.CompilerParams(
            dimension_semantics=("parallel", "arbitrary")),
    )(y, w_up, b_up)

    # ---- tiny O(N*C) SwitchNorm stat mixing in plain JAX ---------------------
    M = jnp.float32(2 * HW)                             # upsampled spatial size
    s_nc = ssum[:, :, 0]                                # (N, C)
    q_nc = ssq[:, :, 0]
    mean_in = s_nc / M
    var_in = (q_nc - M * mean_in * mean_in) / (M - 1.0)  # unbiased (torch .var)
    mean_ln = jnp.mean(mean_in, axis=1, keepdims=True)
    temp = var_in + mean_in * mean_in
    var_ln = jnp.mean(temp, axis=1, keepdims=True) - mean_ln * mean_ln
    mean_bn = jnp.mean(mean_in, axis=0, keepdims=True)   # training-mode batch stat
    var_bn = jnp.mean(temp, axis=0, keepdims=True) - mean_bn * mean_bn
    mw = jax.nn.softmax(params["mean_weight"]).astype(jnp.float32)
    vw = jax.nn.softmax(params["var_weight"]).astype(jnp.float32)
    mean = mw[0] * mean_in + mw[1] * mean_ln + mw[2] * mean_bn
    var = vw[0] * var_in + vw[1] * var_ln + vw[2] * var_bn
    inv = jax.lax.rsqrt(var + 1e-5)

    scale_c = params["sn_w"][None, :] * inv              # (N, C)
    shift_c = params["sn_b"][None, :] - mean * scale_c
    scale2 = jnp.concatenate([scale_c, scale_c], axis=1)[..., None]   # (N, 2C, 1)
    shift2 = jnp.concatenate([shift_c, shift_c], axis=1)[..., None]   # (N, 2C, 1)
    a2 = jnp.concatenate([params["prelu_w"], params["prelu_w"]])[:, None]  # (2C, 1)

    # ---- Kernel B2: 1x1 conv + folded SwitchNorm + PReLU ----------------------
    o0, o1 = pl.pallas_call(
        up_apply_kernel,
        out_shape=(jax.ShapeDtypeStruct((N, C, HW), jnp.float32),
                   jax.ShapeDtypeStruct((N, C, HW), jnp.float32)),
        grid=(N, n_chunks),
        in_specs=[
            pl.BlockSpec((1, C, SC), lambda n, s: (n, 0, s)),
            pl.BlockSpec((2 * C, C), lambda n, s: (0, 0)),
            pl.BlockSpec((2 * C, 1), lambda n, s: (0, 0)),
            pl.BlockSpec((1, 2 * C, 1), lambda n, s: (n, 0, 0)),
            pl.BlockSpec((1, 2 * C, 1), lambda n, s: (n, 0, 0)),
            pl.BlockSpec((2 * C, 1), lambda n, s: (0, 0)),
        ],
        out_specs=(pl.BlockSpec((1, C, SC), lambda n, s: (n, 0, s)),
                   pl.BlockSpec((1, C, SC), lambda n, s: (n, 0, s))),
        compiler_params=pltpu.CompilerParams(
            dimension_semantics=("parallel", "parallel")),
    )(y, w_up, b_up, scale2, shift2, a2)

    # Width pixel-shuffle interleave: final[:, :, h, 2w + r] = o_r[:, :, h*W + w].
    # Already NCHW; no transpose needed.
    return jnp.stack([o0, o1], axis=-1).reshape(N, C, H, 2 * W)


# ---------------------------------------------------------------------------
# Pure-JAX reference (mirrors the PyTorch forward) for a correctness check.
# ---------------------------------------------------------------------------
def ref_forward(x_r, x, p):
    out = jax.lax.conv_general_dilated(
        x, p["conv_w"], (1, 1), [(2, 2), (2, 2)],
        dimension_numbers=("NCHW", "OIHW", "NCHW"))
    out = out + p["conv_b"][None, :, None, None]
    N, C, H, W = out.shape
    mu = out.reshape(N, -1).mean(1).reshape(N, 1, 1, 1)
    var = ((out - mu) ** 2).reshape(N, -1).mean(1).reshape(N, 1, 1, 1)
    gn = (out - mu) / jnp.sqrt(var + 1e-8)
    gn = gn * p["gn_w"][None, :, None, None] + p["gn_b"][None, :, None, None]
    y = x_r * jax.nn.sigmoid(gn)

    z = jnp.einsum("nchw,oc->nohw", y, p["up_w"].reshape(2 * C, C))
    z = z + p["up_b"][None, :, None, None]
    z = z.reshape(N, 2, C, H, W).transpose(0, 2, 3, 4, 1).reshape(N, C, H, 2 * W)

    xv = z.reshape(N, C, -1)
    mean_in = xv.mean(-1, keepdims=True)
    var_in = xv.var(-1, keepdims=True, ddof=1)
    mean_ln = mean_in.mean(1, keepdims=True)
    temp = var_in + mean_in ** 2
    var_ln = temp.mean(1, keepdims=True) - mean_ln ** 2
    mean_bn = mean_in.mean(0, keepdims=True)
    var_bn = temp.mean(0, keepdims=True) - mean_bn ** 2
    mw = jax.nn.softmax(p["mean_weight"])
    vw = jax.nn.softmax(p["var_weight"])
    mean = mw[0] * mean_in + mw[1] * mean_ln + mw[2] * mean_bn
    var = vw[0] * var_in + vw[1] * var_ln + vw[2] * var_bn
    xh = (xv - mean) / jnp.sqrt(var + 1e-5)
    xh = xh.reshape(N, C, H, 2 * W)
    xh = xh * p["sn_w"].reshape(1, C, 1, 1) + p["sn_b"].reshape(1, C, 1, 1)
    a = p["prelu_w"].reshape(1, C, 1, 1)
    return jnp.where(xh >= 0, xh, a * xh)


if __name__ == "__main__":
    N, Cin, Cout, H, W = 2, 4, 8, 16, 16
    key = jax.random.PRNGKey(0)
    ks = jax.random.split(key, 12)

    params = dict(
        conv_w=0.1 * jax.random.normal(ks[0], (Cout, Cin, 5, 5), jnp.float32),
        conv_b=0.1 * jax.random.normal(ks[1], (Cout,), jnp.float32),
        gn_w=1.0 + 0.1 * jax.random.normal(ks[2], (Cout,), jnp.float32),
        gn_b=0.1 * jax.random.normal(ks[3], (Cout,), jnp.float32),
        up_w=0.2 * jax.random.normal(ks[4], (2 * Cout, Cout, 1, 1), jnp.float32),
        up_b=0.1 * jax.random.normal(ks[5], (2 * Cout,), jnp.float32),
        sn_w=1.0 + 0.1 * jax.random.normal(ks[6], (Cout,), jnp.float32),
        sn_b=0.1 * jax.random.normal(ks[7], (Cout,), jnp.float32),
        mean_weight=jnp.ones((3,), jnp.float32),   # SwitchNorm init
        var_weight=jnp.ones((3,), jnp.float32),
        prelu_w=jnp.full((Cout,), 0.25, jnp.float32),  # nn.PReLU default init
    )

    x = jax.random.normal(ks[8], (N, Cin, H, W), jnp.float32)
    x_r = jax.random.normal(ks[9], (N, Cout, H, W), jnp.float32)

    out = jax.block_until_ready(fc_forward(x_r, x, params))
    assert out.shape == (N, Cout, H, 2 * W)

    ref = ref_forward(x_r, x, params)
    np.testing.assert_allclose(np.asarray(out), np.asarray(ref), rtol=1e-3, atol=1e-3)

    print("KERNEL_OK")
</pallas_src>

<mosaic_0001>
module attributes {stable_mosaic.version = 11 : i64} {
  func.func @conv_gn_gate_kernel(%arg0: i32, %arg1: memref<1x100x256xf32, #tpu.memory_space<vmem>>, %arg2: memref<8x100xf32, #tpu.memory_space<vmem>>, %arg3: memref<8x1xf32, #tpu.memory_space<vmem>>, %arg4: memref<8x1xf32, #tpu.memory_space<vmem>>, %arg5: memref<8x1xf32, #tpu.memory_space<vmem>>, %arg6: memref<1x8x256xf32, #tpu.memory_space<vmem>>, %arg7: memref<1x8x256xf32, #tpu.memory_space<vmem>>) attributes {dimension_semantics = [#tpu.dimension_semantics<parallel>], iteration_bounds = array<i64: 2>, scalar_prefetch = 0 : i64, scratch_operands = 0 : i64, tpu.core_type = #tpu.core_type<tc>, window_params = [{transform_indices = @transform_0, window_bounds = array<i64: 1, 100, 256>}, {pipeline_mode = #tpu.pipeline_mode<synchronous>, transform_indices = @transform_1, window_bounds = array<i64: 8, 100>}, {pipeline_mode = #tpu.pipeline_mode<synchronous>, transform_indices = @transform_2, window_bounds = array<i64: 8, 1>}, {pipeline_mode = #tpu.pipeline_mode<synchronous>, transform_indices = @transform_3, window_bounds = array<i64: 8, 1>}, {pipeline_mode = #tpu.pipeline_mode<synchronous>, transform_indices = @transform_4, window_bounds = array<i64: 8, 1>}, {transform_indices = @transform_5, window_bounds = array<i64: 1, 8, 256>}, {transform_indices = @transform_6, window_bounds = array<i64: 1, 8, 256>}]} {
    %c0 = arith.constant 0 : index
    %c0_0 = arith.constant 0 : index
    %0 = vector.load %arg2[%c0, %c0_0] : memref<8x100xf32, #tpu.memory_space<vmem>>, vector<8x100xf32>
    %c0_1 = arith.constant 0 : index
    %c0_2 = arith.constant 0 : index
    %c0_3 = arith.constant 0 : index
    %1 = vector.load %arg1[%c0_1, %c0_2, %c0_3] : memref<1x100x256xf32, #tpu.memory_space<vmem>>, vector<1x100x256xf32>
    %2 = vector.shape_cast %1 : vector<1x100x256xf32> to vector<100x256xf32>
    %cst = arith.constant dense<0.000000e+00> : vector<8x256xf32>
    %3 = tpu.matmul %0, %2, %cst {dimension_numbers = #tpu.dot_dimension_numbers<[1], [0], [0], [1], [0, 0, 1, 1], [], []>} : vector<8x100xf32>, vector<100x256xf32>, vector<8x256xf32> -> vector<8x256xf32>
    %c0_4 = arith.constant 0 : index
    %c0_5 = arith.constant 0 : index
    %4 = vector.load %arg3[%c0_4, %c0_5] : memref<8x1xf32, #tpu.memory_space<vmem>>, vector<8x1xf32>
    %5 = vector.broadcast %4 : vector<8x1xf32> to vector<8x256xf32>
    %6 = arith.addf %3, %5 : vector<8x256xf32>
    %7 = vector.shape_cast %6 : vector<8x256xf32> to vector<1x8x256xf32>
    %cst_6 = arith.constant dense<0.000000e+00> : vector<1xf32>
    %8 = vector.multi_reduction <add>, %7, %cst_6 [1, 2] : vector<1x8x256xf32> to vector<1xf32>
    %9 = vector.shape_cast %8 : vector<1xf32> to vector<1x1x1xf32>
    %10 = vector.extract %9[0, 0, 0] : f32 from vector<1x1x1xf32>
    %cst_7 = arith.constant 2.048000e+03 : f32
    %11 = arith.divf %10, %cst_7 : f32
    %12 = vector.broadcast %11 : f32 to vector<8x256xf32>
    %13 = arith.subf %6, %12 : vector<8x256xf32>
    %14 = arith.mulf %13, %13 : vector<8x256xf32>
    %15 = vector.shape_cast %14 : vector<8x256xf32> to vector<1x8x256xf32>
    %cst_8 = arith.constant dense<0.000000e+00> : vector<1xf32>
    %16 = vector.multi_reduction <add>, %15, %cst_8 [1, 2] : vector<1x8x256xf32> to vector<1xf32>
    %17 = vector.shape_cast %16 : vector<1xf32> to vector<1x1x1xf32>
    %18 = vector.extract %17[0, 0, 0] : f32 from vector<1x1x1xf32>
    %cst_9 = arith.constant 2.048000e+03 : f32
    %19 = arith.divf %18, %cst_9 : f32
    %20 = vector.broadcast %11 : f32 to vector<8x256xf32>
    %21 = arith.subf %6, %20 : vector<8x256xf32>
    %cst_10 = arith.constant 9.99999993E-9 : f32
    %22 = arith.addf %19, %cst_10 : f32
    %23 = math.rsqrt %22 : f32
    %24 = vector.broadcast %23 : f32 to vector<8x256xf32>
    %25 = arith.mulf %21, %24 : vector<8x256xf32>
    %c0_11 = arith.constant 0 : index
    %c0_12 = arith.constant 0 : index
    %26 = vector.load %arg4[%c0_11, %c0_12] : memref<8x1xf32, #tpu.memory_space<vmem>>, vector<8x1xf32>
    %27 = vector.broadcast %26 : vector<8x1xf32> to vector<8x256xf32>
    %28 = arith.mulf %25, %27 : vector<8x256xf32>
    %c0_13 = arith.constant 0 : index
    %c0_14 = arith.constant 0 : index
    %29 = vector.load %arg5[%c0_13, %c0_14] : memref<8x1xf32, #tpu.memory_space<vmem>>, vector<8x1xf32>
    %30 = vector.broadcast %29 : vector<8x1xf32> to vector<8x256xf32>
    %31 = arith.addf %28, %30 : vector<8x256xf32>
    %c0_15 = arith.constant 0 : index
    %c0_16 = arith.constant 0 : index
    %c0_17 = arith.constant 0 : index
    %32 = vector.load %arg6[%c0_15, %c0_16, %c0_17] : memref<1x8x256xf32, #tpu.memory_space<vmem>>, vector<1x8x256xf32>
    %33 = vector.shape_cast %32 : vector<1x8x256xf32> to vector<8x256xf32>
    %34 = arith.negf %31 : vector<8x256xf32>
    %35 = math.exp %34 : vector<8x256xf32>
    %cst_18 = arith.constant 1.000000e+00 : f32
    %36 = vector.broadcast %cst_18 : f32 to vector<8x256xf32>
    %37 = arith.addf %36, %35 : vector<8x256xf32>
    %38 = arith.divf %36, %37 : vector<8x256xf32>
    %39 = arith.mulf %33, %38 : vector<8x256xf32>
    %c0_19 = arith.constant 0 : index
    %c0_20 = arith.constant 0 : index
    %c0_21 = arith.constant 0 : index
    %40 = vector.load %arg7[%c0_19, %c0_20, %c0_21] : memref<1x8x256xf32, #tpu.memory_space<vmem>>, vector<1x8x256xf32>
    %41 = vector.shape_cast %40 : vector<1x8x256xf32> to vector<8x256xf32>
    %42 = vector.shape_cast %39 : vector<8x256xf32> to vector<1x8x256xf32>
    tpu.vector_store %arg7[%c0_19, %c0_20, %c0_21], %42 {strides = array<i32>} : memref<1x8x256xf32, #tpu.memory_space<vmem>>, vector<1x8x256xf32>,
    return
  }
  func.func @transform_0(%arg0: i32) -> (i32, i32, i32) {
    %c0_i32 = arith.constant 0 : i32
    %c0_i32_0 = arith.constant 0 : i32
    %c0_i32_1 = arith.constant 0 : i32
    return %arg0, %c0_i32, %c0_i32_0 : i32, i32, i32
  }
  func.func @transform_1(%arg0: i32) -> (i32, i32) {
    %c0_i32 = arith.constant 0 : i32
    %c0_i32_0 = arith.constant 0 : i32
    %c0_i32_1 = arith.constant 0 : i32
    return %c0_i32, %c0_i32_0 : i32, i32
  }
  func.func @transform_2(%arg0: i32) -> (i32, i32) {
    %c0_i32 = arith.constant 0 : i32
    %c0_i32_0 = arith.constant 0 : i32
    %c0_i32_1 = arith.constant 0 : i32
    return %c0_i32, %c0_i32_0 : i32, i32
  }
  func.func @transform_3(%arg0: i32) -> (i32, i32) {
    %c0_i32 = arith.constant 0 : i32
    %c0_i32_0 = arith.constant 0 : i32
    %c0_i32_1 = arith.constant 0 : i32
    return %c0_i32, %c0_i32_0 : i32, i32
  }
  func.func @transform_4(%arg0: i32) -> (i32, i32) {
    %c0_i32 = arith.constant 0 : i32
    %c0_i32_0 = arith.constant 0 : i32
    %c0_i32_1 = arith.constant 0 : i32
    return %c0_i32, %c0_i32_0 : i32, i32
  }
  func.func @transform_5(%arg0: i32) -> (i32, i32, i32) {
    %c0_i32 = arith.constant 0 : i32
    %c0_i32_0 = arith.constant 0 : i32
    %c0_i32_1 = arith.constant 0 : i32
    return %arg0, %c0_i32, %c0_i32_0 : i32, i32, i32
  }
  func.func @transform_6(%arg0: i32) -> (i32, i32, i32) {
    %c0_i32 = arith.constant 0 : i32
    %c0_i32_0 = arith.constant 0 : i32
    %c0_i32_1 = arith.constant 0 : i32
    return %arg0, %c0_i32, %c0_i32_0 : i32, i32, i32
  }
}

module attributes {stable_mosaic.version = 11 : i64} {
  func.func @up_stats_kernel(%arg0: i32, %arg1: i32, %arg2: memref<1x8x256xf32, #tpu.memory_space<vmem>>, %arg3: memref<16x8xf32, #tpu.memory_space<vmem>>, %arg4: memref<16x1xf32, #tpu.memory_space<vmem>>, %arg5: memref<1x8x1xf32, #tpu.memory_space<vmem>>, %arg6: memref<1x8x1xf32, #tpu.memory_space<vmem>>) attributes {dimension_semantics = [#tpu.dimension_semantics<parallel>, #tpu.dimension_semantics<arbitrary>], iteration_bounds = array<i64: 2, 1>, scalar_prefetch = 0 : i64, scratch_operands = 0 : i64, tpu.core_type = #tpu.core_type<tc>, window_params = [{transform_indices = @transform_0, window_bounds = array<i64: 1, 8, 256>}, {pipeline_mode = #tpu.pipeline_mode<synchronous>, transform_indices = @transform_1, window_bounds = array<i64: 16, 8>}, {pipeline_mode = #tpu.pipeline_mode<synchronous>, transform_indices = @transform_2, window_bounds = array<i64: 16, 1>}, {transform_indices = @transform_3, window_bounds = array<i64: 1, 8, 1>}, {transform_indices = @transform_4, window_bounds = array<i64: 1, 8, 1>}]} {
    %c0_i32 = arith.constant 0 : i32
    %0 = arith.cmpi eq, %arg1, %c0_i32 : i32
    %1 = arith.extui %0 : i1 to i32
    %c0_i32_0 = arith.constant 0 : i32
    %2 = arith.cmpi ne, %1, %c0_i32_0 : i32
    scf.if %2 {
      %cst_23 = arith.constant 0.000000e+00 : f32
      %36 = vector.broadcast %cst_23 : f32 to vector<1x8x1xf32>
      %c0_24 = arith.constant 0 : index
      %c0_25 = arith.constant 0 : index
      %c0_26 = arith.constant 0 : index
      %37 = vector.load %arg5[%c0_24, %c0_25, %c0_26] : memref<1x8x1xf32, #tpu.memory_space<vmem>>, vector<1x8x1xf32>
      tpu.vector_store %arg5[%c0_24, %c0_25, %c0_26], %36 {strides = array<i32>} : memref<1x8x1xf32, #tpu.memory_space<vmem>>, vector<1x8x1xf32>,
      %cst_27 = arith.constant 0.000000e+00 : f32
      %38 = vector.broadcast %cst_27 : f32 to vector<1x8x1xf32>
      %c0_28 = arith.constant 0 : index
      %c0_29 = arith.constant 0 : index
      %c0_30 = arith.constant 0 : index
      %39 = vector.load %arg6[%c0_28, %c0_29, %c0_30] : memref<1x8x1xf32, #tpu.memory_space<vmem>>, vector<1x8x1xf32>
      tpu.vector_store %arg6[%c0_28, %c0_29, %c0_30], %38 {strides = array<i32>} : memref<1x8x1xf32, #tpu.memory_space<vmem>>, vector<1x8x1xf32>,
    } else {
    }
    %c0 = arith.constant 0 : index
    %c0_1 = arith.constant 0 : index
    %3 = vector.load %arg3[%c0, %c0_1] : memref<16x8xf32, #tpu.memory_space<vmem>>, vector<16x8xf32>
    %c0_2 = arith.constant 0 : index
    %c0_3 = arith.constant 0 : index
    %c0_4 = arith.constant 0 : index
    %4 = vector.load %arg2[%c0_2, %c0_3, %c0_4] : memref<1x8x256xf32, #tpu.memory_space<vmem>>, vector<1x8x256xf32>
    %5 = vector.shape_cast %4 : vector<1x8x256xf32> to vector<8x256xf32>
    %cst = arith.constant dense<0.000000e+00> : vector<16x256xf32>
    %6 = tpu.matmul %3, %5, %cst {dimension_numbers = #tpu.dot_dimension_numbers<[1], [0], [0], [1], [0, 0, 1, 1], [], []>} : vector<16x8xf32>, vector<8x256xf32>, vector<16x256xf32> -> vector<16x256xf32>
    %c0_5 = arith.constant 0 : index
    %c0_6 = arith.constant 0 : index
    %7 = vector.load %arg4[%c0_5, %c0_6] : memref<16x1xf32, #tpu.memory_space<vmem>>, vector<16x1xf32>
    %8 = vector.broadcast %7 : vector<16x1xf32> to vector<16x256xf32>
    %9 = arith.addf %6, %8 : vector<16x256xf32>
    %10 = vector.extract_strided_slice %9 {offsets = [0, 0], sizes = [8, 256], strides = [1, 1]} : vector<16x256xf32> to vector<8x256xf32>
    %11 = vector.extract_strided_slice %9 {offsets = [8, 0], sizes = [8, 256], strides = [1, 1]} : vector<16x256xf32> to vector<8x256xf32>
    %c0_7 = arith.constant 0 : index
    %c0_8 = arith.constant 0 : index
    %c0_9 = arith.constant 0 : index
    %12 = vector.load %arg5[%c0_7, %c0_8, %c0_9] : memref<1x8x1xf32, #tpu.memory_space<vmem>>, vector<1x8x1xf32>
    %13 = vector.shape_cast %12 : vector<1x8x1xf32> to vector<8x1xf32>
    %cst_10 = arith.constant dense<0.000000e+00> : vector<8xf32>
    %14 = vector.multi_reduction <add>, %10, %cst_10 [1] : vector<8x256xf32> to vector<8xf32>
    %15 = vector.shape_cast %14 : vector<8xf32> to vector<8x1xf32>
    %cst_11 = arith.constant dense<0.000000e+00> : vector<8xf32>
    %16 = vector.multi_reduction <add>, %11, %cst_11 [1] : vector<8x256xf32> to vector<8xf32>
    %17 = vector.shape_cast %16 : vector<8xf32> to vector<8x1xf32>
    %18 = arith.addf %15, %17 : vector<8x1xf32>
    %19 = arith.addf %13, %18 : vector<8x1xf32>
    %c0_12 = arith.constant 0 : index
    %c0_13 = arith.constant 0 : index
    %c0_14 = arith.constant 0 : index
    %20 = vector.load %arg5[%c0_12, %c0_13, %c0_14] : memref<1x8x1xf32, #tpu.memory_space<vmem>>, vector<1x8x1xf32>
    %21 = vector.shape_cast %20 : vector<1x8x1xf32> to vector<8x1xf32>
    %22 = vector.shape_cast %19 : vector<8x1xf32> to vector<1x8x1xf32>
    tpu.vector_store %arg5[%c0_12, %c0_13, %c0_14], %22 {strides = array<i32>} : memref<1x8x1xf32, #tpu.memory_space<vmem>>, vector<1x8x1xf32>,
    %c0_15 = arith.constant 0 : index
    %c0_16 = arith.constant 0 : index
    %c0_17 = arith.constant 0 : index
    %23 = vector.load %arg6[%c0_15, %c0_16, %c0_17] : memref<1x8x1xf32, #tpu.memory_space<vmem>>, vector<1x8x1xf32>
    %24 = vector.shape_cast %23 : vector<1x8x1xf32> to vector<8x1xf32>
    %25 = arith.mulf %10, %10 : vector<8x256xf32>
    %cst_18 = arith.constant dense<0.000000e+00> : vector<8xf32>
    %26 = vector.multi_reduction <add>, %25, %cst_18 [1] : vector<8x256xf32> to vector<8xf32>
    %27 = vector.shape_cast %26 : vector<8xf32> to vector<8x1xf32>
    %28 = arith.mulf %11, %11 : vector<8x256xf32>
    %cst_19 = arith.constant dense<0.000000e+00> : vector<8xf32>
    %29 = vector.multi_reduction <add>, %28, %cst_19 [1] : vector<8x256xf32> to vector<8xf32>
    %30 = vector.shape_cast %29 : vector<8xf32> to vector<8x1xf32>
    %31 = arith.addf %27, %30 : vector<8x1xf32>
    %32 = arith.addf %24, %31 : vector<8x1xf32>
    %c0_20 = arith.constant 0 : index
    %c0_21 = arith.constant 0 : index
    %c0_22 = arith.constant 0 : index
    %33 = vector.load %arg6[%c0_20, %c0_21, %c0_22] : memref<1x8x1xf32, #tpu.memory_space<vmem>>, vector<1x8x1xf32>
    %34 = vector.shape_cast %33 : vector<1x8x1xf32> to vector<8x1xf32>
    %35 = vector.shape_cast %32 : vector<8x1xf32> to vector<1x8x1xf32>
    tpu.vector_store %arg6[%c0_20, %c0_21, %c0_22], %35 {strides = array<i32>} : memref<1x8x1xf32, #tpu.memory_space<vmem>>, vector<1x8x1xf32>,
    return
  }
  func.func @transform_0(%arg0: i32, %arg1: i32) -> (i32, i32, i32) {
    %c0_i32 = arith.constant 0 : i32
    %c0_i32_0 = arith.constant 0 : i32
    return %arg0, %c0_i32, %arg1 : i32, i32, i32
  }
  func.func @transform_1(%arg0: i32, %arg1: i32) -> (i32, i32) {
    %c0_i32 = arith.constant 0 : i32
    %c0_i32_0 = arith.constant 0 : i32
    %c0_i32_1 = arith.constant 0 : i32
    return %c0_i32, %c0_i32_0 : i32, i32
  }
  func.func @transform_2(%arg0: i32, %arg1: i32) -> (i32, i32) {
    %c0_i32 = arith.constant 0 : i32
    %c0_i32_0 = arith.constant 0 : i32
    %c0_i32_1 = arith.constant 0 : i32
    return %c0_i32, %c0_i32_0 : i32, i32
  }
  func.func @transform_3(%arg0: i32, %arg1: i32) -> (i32, i32, i32) {
    %c0_i32 = arith.constant 0 : i32
    %c0_i32_0 = arith.constant 0 : i32
    %c0_i32_1 = arith.constant 0 : i32
    return %arg0, %c0_i32, %c0_i32_0 : i32, i32, i32
  }
  func.func @transform_4(%arg0: i32, %arg1: i32) -> (i32, i32, i32) {
    %c0_i32 = arith.constant 0 : i32
    %c0_i32_0 = arith.constant 0 : i32
    %c0_i32_1 = arith.constant 0 : i32
    return %arg0, %c0_i32, %c0_i32_0 : i32, i32, i32
  }
}

module attributes {stable_mosaic.version = 11 : i64} {
  func.func @up_apply_kernel(%arg0: i32, %arg1: i32, %arg2: memref<1x8x256xf32, #tpu.memory_space<vmem>>, %arg3: memref<16x8xf32, #tpu.memory_space<vmem>>, %arg4: memref<16x1xf32, #tpu.memory_space<vmem>>, %arg5: memref<1x16x1xf32, #tpu.memory_space<vmem>>, %arg6: memref<1x16x1xf32, #tpu.memory_space<vmem>>, %arg7: memref<16x1xf32, #tpu.memory_space<vmem>>, %arg8: memref<1x8x256xf32, #tpu.memory_space<vmem>>, %arg9: memref<1x8x256xf32, #tpu.memory_space<vmem>>) attributes {dimension_semantics = [#tpu.dimension_semantics<parallel>, #tpu.dimension_semantics<parallel>], iteration_bounds = array<i64: 2, 1>, scalar_prefetch = 0 : i64, scratch_operands = 0 : i64, tpu.core_type = #tpu.core_type<tc>, window_params = [{transform_indices = @transform_0, window_bounds = array<i64: 1, 8, 256>}, {pipeline_mode = #tpu.pipeline_mode<synchronous>, transform_indices = @transform_1, window_bounds = array<i64: 16, 8>}, {pipeline_mode = #tpu.pipeline_mode<synchronous>, transform_indices = @transform_2, window_bounds = array<i64: 16, 1>}, {transform_indices = @transform_3, window_bounds = array<i64: 1, 16, 1>}, {transform_indices = @transform_4, window_bounds = array<i64: 1, 16, 1>}, {pipeline_mode = #tpu.pipeline_mode<synchronous>, transform_indices = @transform_5, window_bounds = array<i64: 16, 1>}, {transform_indices = @transform_6, window_bounds = array<i64: 1, 8, 256>}, {transform_indices = @transform_7, window_bounds = array<i64: 1, 8, 256>}]} {
    %c0 = arith.constant 0 : index
    %c0_0 = arith.constant 0 : index
    %0 = vector.load %arg3[%c0, %c0_0] : memref<16x8xf32, #tpu.memory_space<vmem>>, vector<16x8xf32>
    %c0_1 = arith.constant 0 : index
    %c0_2 = arith.constant 0 : index
    %c0_3 = arith.constant 0 : index
    %1 = vector.load %arg2[%c0_1, %c0_2, %c0_3] : memref<1x8x256xf32, #tpu.memory_space<vmem>>, vector<1x8x256xf32>
    %2 = vector.shape_cast %1 : vector<1x8x256xf32> to vector<8x256xf32>
    %cst = arith.constant dense<0.000000e+00> : vector<16x256xf32>
    %3 = tpu.matmul %0, %2, %cst {dimension_numbers = #tpu.dot_dimension_numbers<[1], [0], [0], [1], [0, 0, 1, 1], [], []>} : vector<16x8xf32>, vector<8x256xf32>, vector<16x256xf32> -> vector<16x256xf32>
    %c0_4 = arith.constant 0 : index
    %c0_5 = arith.constant 0 : index
    %4 = vector.load %arg4[%c0_4, %c0_5] : memref<16x1xf32, #tpu.memory_space<vmem>>, vector<16x1xf32>
    %5 = vector.broadcast %4 : vector<16x1xf32> to vector<16x256xf32>
    %6 = arith.addf %3, %5 : vector<16x256xf32>
    %c0_6 = arith.constant 0 : index
    %c0_7 = arith.constant 0 : index
    %c0_8 = arith.constant 0 : index
    %7 = vector.load %arg5[%c0_6, %c0_7, %c0_8] : memref<1x16x1xf32, #tpu.memory_space<vmem>>, vector<1x16x1xf32>
    %8 = vector.shape_cast %7 : vector<1x16x1xf32> to vector<16x1xf32>
    %9 = vector.broadcast %8 : vector<16x1xf32> to vector<16x256xf32>
    %10 = arith.mulf %6, %9 : vector<16x256xf32>
    %c0_9 = arith.constant 0 : index
    %c0_10 = arith.constant 0 : index
    %c0_11 = arith.constant 0 : index
    %11 = vector.load %arg6[%c0_9, %c0_10, %c0_11] : memref<1x16x1xf32, #tpu.memory_space<vmem>>, vector<1x16x1xf32>
    %12 = vector.shape_cast %11 : vector<1x16x1xf32> to vector<16x1xf32>
    %13 = vector.broadcast %12 : vector<16x1xf32> to vector<16x256xf32>
    %14 = arith.addf %10, %13 : vector<16x256xf32>
    %cst_12 = arith.constant 0.000000e+00 : f32
    %15 = vector.broadcast %cst_12 : f32 to vector<16x256xf32>
    %16 = arith.cmpf oge, %14, %15 : vector<16x256xf32>
    %c0_13 = arith.constant 0 : index
    %c0_14 = arith.constant 0 : index
    %17 = vector.load %arg7[%c0_13, %c0_14] : memref<16x1xf32, #tpu.memory_space<vmem>>, vector<16x1xf32>
    %18 = vector.broadcast %17 : vector<16x1xf32> to vector<16x256xf32>
    %19 = arith.mulf %18, %14 : vector<16x256xf32>
    %20 = arith.select %16, %14, %19 : vector<16x256xi1>, vector<16x256xf32>
    %21 = vector.extract_strided_slice %20 {offsets = [0, 0], sizes = [8, 256], strides = [1, 1]} : vector<16x256xf32> to vector<8x256xf32>
    %c0_15 = arith.constant 0 : index
    %c0_16 = arith.constant 0 : index
    %c0_17 = arith.constant 0 : index
    %22 = vector.load %arg8[%c0_15, %c0_16, %c0_17] : memref<1x8x256xf32, #tpu.memory_space<vmem>>, vector<1x8x256xf32>
    %23 = vector.shape_cast %22 : vector<1x8x256xf32> to vector<8x256xf32>
    %24 = vector.shape_cast %21 : vector<8x256xf32> to vector<1x8x256xf32>
    tpu.vector_store %arg8[%c0_15, %c0_16, %c0_17], %24 {strides = array<i32>} : memref<1x8x256xf32, #tpu.memory_space<vmem>>, vector<1x8x256xf32>,
    %25 = vector.extract_strided_slice %20 {offsets = [8, 0], sizes = [8, 256], strides = [1, 1]} : vector<16x256xf32> to vector<8x256xf32>
    %c0_18 = arith.constant 0 : index
    %c0_19 = arith.constant 0 : index
    %c0_20 = arith.constant 0 : index
    %26 = vector.load %arg9[%c0_18, %c0_19, %c0_20] : memref<1x8x256xf32, #tpu.memory_space<vmem>>, vector<1x8x256xf32>
    %27 = vector.shape_cast %26 : vector<1x8x256xf32> to vector<8x256xf32>
    %28 = vector.shape_cast %25 : vector<8x256xf32> to vector<1x8x256xf32>
    tpu.vector_store %arg9[%c0_18, %c0_19, %c0_20], %28 {strides = array<i32>} : memref<1x8x256xf32, #tpu.memory_space<vmem>>, vector<1x8x256xf32>,
    return
  }
  func.func @transform_0(%arg0: i32, %arg1: i32) -> (i32, i32, i32) {
    %c0_i32 = arith.constant 0 : i32
    %c0_i32_0 = arith.constant 0 : i32
    return %arg0, %c0_i32, %arg1 : i32, i32, i32
  }
  func.func @transform_1(%arg0: i32, %arg1: i32) -> (i32, i32) {
    %c0_i32 = arith.constant 0 : i32
    %c0_i32_0 = arith.constant 0 : i32
    %c0_i32_1 = arith.constant 0 : i32
    return %c0_i32, %c0_i32_0 : i32, i32
  }
  func.func @transform_2(%arg0: i32, %arg1: i32) -> (i32, i32) {
    %c0_i32 = arith.constant 0 : i32
    %c0_i32_0 = arith.constant 0 : i32
    %c0_i32_1 = arith.constant 0 : i32
    return %c0_i32, %c0_i32_0 : i32, i32
  }
  func.func @transform_3(%arg0: i32, %arg1: i32) -> (i32, i32, i32) {
    %c0_i32 = arith.constant 0 : i32
    %c0_i32_0 = arith.constant 0 : i32
    %c0_i32_1 = arith.constant 0 : i32
    return %arg0, %c0_i32, %c0_i32_0 : i32, i32, i32
  }
  func.func @transform_4(%arg0: i32, %arg1: i32) -> (i32, i32, i32) {
    %c0_i32 = arith.constant 0 : i32
    %c0_i32_0 = arith.constant 0 : i32
    %c0_i32_1 = arith.constant 0 : i32
    return %arg0, %c0_i32, %c0_i32_0 : i32, i32, i32
  }
  func.func @transform_5(%arg0: i32, %arg1: i32) -> (i32, i32) {
    %c0_i32 = arith.constant 0 : i32
    %c0_i32_0 = arith.constant 0 : i32
    %c0_i32_1 = arith.constant 0 : i32
    return %c0_i32, %c0_i32_0 : i32, i32
  }
  func.func @transform_6(%arg0: i32, %arg1: i32) -> (i32, i32, i32) {
    %c0_i32 = arith.constant 0 : i32
    %c0_i32_0 = arith.constant 0 : i32
    return %arg0, %c0_i32, %arg1 : i32, i32, i32
  }
  func.func @transform_7(%arg0: i32, %arg1: i32) -> (i32, i32, i32) {
    %c0_i32 = arith.constant 0 : i32
    %c0_i32_0 = arith.constant 0 : i32
    return %arg0, %c0_i32, %arg1 : i32, i32, i32
  }
}

</mosaic_0001>

<bundles_post_ra>
// kernel: fc_forward.3
= control target key start
LH: loop header
LB: loop body
LE: loop exit
PB: predicated region body
PF: predicated region fallthrough
CT: control target
= control target key end

     0   :  { %s641_s21 = smov 0   ;;  %s705_s0 = inlined_call_operand.vmem [shape: f32[2,100,256], index: 0, kind: input, shape index: {}]   ;;  %s706_s1 = inlined_call_operand.vmem [shape: f32[8,100], index: 1, kind: input, shape index: {}]   ;;  %s707_s2 = inlined_call_operand.vmem [shape: f32[8,1], index: 2, kind: input, shape index: {}]   ;;  %s708_s3 = inlined_call_operand.vmem [shape: f32[8,1], index: 3, kind: input, shape index: {}]   ;;  %s709_s4 = inlined_call_operand.vmem [shape: f32[8,1], index: 4, kind: input, shape index: {}]   ;;  %s710_s5 = inlined_call_operand.vmem [shape: f32[2,8,256], index: 5, kind: input, shape index: {}]   ;;  %s711_s6 = inlined_call_operand.vmem [shape: f32[2,8,256], index: 6, kind: output, shape index: {}]  }
   0x1 LB: > { %s542_s22 = sadd.s32 4294967295, %s602_s21   ;;  %p546_p0 = scmp.ge.s32.totalorder %s602_s21, 1  ;;  %s602_s21 = sphi %s641_s21, %s16_s21  }
   0x2   : > { %p222_p1 = scmp.lt.s32.totalorder %s602_s21, 3 }
   0x4   : > { %p223_p2 = pnand %p546_p0, %p222_p1 }
   0x5   : > { %p257_p3 = scmp.lt.s32.totalorder (!%p223_p2), %s542_s22, 1 }
   0x6   : > { %226 = sbr.rel (%p223_p2) target bundleno = 649 (0x289), region = 44 }
   0xb   : > { %v299_v0 = vld [vmem:[%s707_s2] sm:$0xff]  ;;  %s713_s22 = smov (!%p257_p3, %s542_s22), 1  ;;  %v604_v1 = vmov 0   ;;  %vm309_vm0 = vcmask 1043456   ;;  %vm305_vm1 = vcmask 818176   ;;  %v605_v35 = vmov 2048.0  }
   0xc   : > { %581 = vset.pattern.permute.xlu0 %v604_v1  ;;  %582 = vset.pattern.permute.xlu1 %v604_v1  ;;  %s562_s25 = smul.u32 208, %s713_s22  ;;  %v272_v28 = vld [vmem:[%s706_s1] sm:$0xff]  ;;  %584 = vrcp.f32 %v605_v35  ;;  %s560_s18 = sshll.u32 %s713_s22, 4 }
   0xd   : > { %302 = vperm.xlu0 %581, %v299_v0   ;;  %583 = vset.pattern.permute.xlu2 %v604_v1  ;;  %v415_v55 = vld [vmem:[%s708_s3] sm:$0xff]  ;;  %s266_s23 = scalar_lea.vmem %s710_s5, %s560_s18 }
   0xe   : > { %s658_s28 = scalar_lea.vmem %s705_s0, %s562_s25  ;;  %v423_v56 = vld [vmem:[%s709_s4] sm:$0xff]  ;;  %s271_s25 = scalar_lea.vmem %s711_s6, %s560_s18 }
   0xf   : > { %v297_v2 = vld [vmem:[%s658_s28 + $0xc0] sm:$0xf]  ;;  %v298_v3 = vld [vmem:[%s658_s28 + $0xc8] sm:$0xf]  ;;  %v295_v4 = vld [vmem:[%s658_s28 + $0xb0] sm:$0xff]  ;;  %426 = vperm.xlu2 %583, %v423_v56  }
  0x10   : > { %552 = vmatpush.msk.msra.mxu0 %vm309_vm0, %v297_v2  ;;  %554 = vmatpush.msk.msra.mxu1 %vm309_vm0, %v298_v3  ;;  %v296_v5 = vld [vmem:[%s658_s28 + $0xb8] sm:$0xff]  ;;  %v293_v6 = vld [vmem:[%s658_s28 + $0xa0] sm:$0xff]  ;;  %v294_v7 = vld [vmem:[%s658_s28 + $0xa8] sm:$0xff] }
  0x11   : > { %v291_v8 = vld [vmem:[%s658_s28 + $0x90] sm:$0xff]  ;;  %v292_v9 = vld [vmem:[%s658_s28 + $0x98] sm:$0xff]  ;;  %v289_v10 = vld [vmem:[%s658_s28 + $0x80] sm:$0xff] }
  0x12   : > { %320 = vmatpush.msra.mxu0 %v295_v4  ;;  %340 = vmatpush.msra.mxu1 %v296_v5  ;;  %v290_v11 = vld [vmem:[%s658_s28 + $0x88] sm:$0xff]  ;;  %v287_v12 = vld [vmem:[%s658_s28 + $0x70] sm:$0xff]  ;;  %v288_v13 = vld [vmem:[%s658_s28 + $0x78] sm:$0xff]  ;;  %v585_v36 = vpop.eup %584 }
  0x13   : > { %v285_v14 = vld [vmem:[%s658_s28 + $0x60] sm:$0xff]  ;;  %v286_v15 = vld [vmem:[%s658_s28 + $0x68] sm:$0xff]  ;;  %v283_v16 = vld [vmem:[%s658_s28 + $0x50] sm:$0xff]  ;;  %v367_v37 = vmul.f32 2048.0, %v585_v36  ;;  %vm371_vm2 = vweird.f32 %v585_v36 }
  0x14   : > { %321 = vmatpush.msra.mxu0 %v293_v6  ;;  %341 = vmatpush.msra.mxu1 %v294_v7  ;;  %v284_v17 = vld [vmem:[%s658_s28 + $0x58] sm:$0xff]  ;;  %v281_v18 = vld [vmem:[%s658_s28 + $0x40] sm:$0xff]  ;;  %v282_v19 = vld [vmem:[%s658_s28 + $0x48] sm:$0xff] }
  0x15   : > { %v279_v20 = vld [vmem:[%s658_s28 + $0x30] sm:$0xff]  ;;  %v280_v21 = vld [vmem:[%s658_s28 + $0x38] sm:$0xff]  ;;  %v277_v22 = vld [vmem:[%s658_s28 + $0x20] sm:$0xff]  ;;  %v368_v38 = vsub.f32 1.0, %v367_v37 }
  0x16   : > { %322 = vmatpush.msra.mxu0 %v291_v8  ;;  %342 = vmatpush.msra.mxu1 %v292_v9  ;;  %v278_v23 = vld [vmem:[%s658_s28 + $0x28] sm:$0xff]  ;;  %v275_v24 = vld [vmem:[%s658_s28 + $0x10] sm:$0xff]  ;;  %v276_v25 = vld [vmem:[%s658_s28 + $0x18] sm:$0xff] }
  0x17   : > { %v273_v26 = vld [vmem:[%s658_s28] sm:$0xff]  ;;  %v274_v27 = vld [vmem:[%s658_s28 + $0x8] sm:$0xff]  ;;  %v369_v42 = vmul.f32 %v585_v36, %v368_v38 }
  0x18   : > { %323 = vmatpush.msra.mxu0 %v289_v10  ;;  %343 = vmatpush.msra.mxu1 %v290_v11 }
  0x19   : > { %v370_v45 = vadd.f32 %v585_v36, %v369_v42 }
  0x1a   : > { %324 = vmatpush.msra.mxu0 %v287_v12  ;;  %344 = vmatpush.msra.mxu1 %v288_v13 }
  0x1b   : > { %v372_v48 = vsel %vm371_vm2, %v585_v36, %v370_v45  ;;  %v431_v36 = vld [vmem:[%s266_s23] sm:$0xff] }
  0x1c   : > { %325 = vmatpush.msra.mxu0 %v285_v14  ;;  %345 = vmatpush.msra.mxu1 %v286_v15 }
  0x1e   : > { %326 = vmatpush.msra.mxu0 %v283_v16  ;;  %346 = vmatpush.msra.mxu1 %v284_v17 }
  0x20   : > { %327 = vmatpush.msra.mxu0 %v281_v18  ;;  %347 = vmatpush.msra.mxu1 %v282_v19 }
  0x22   : > { %328 = vmatpush.msra.mxu0 %v279_v20  ;;  %348 = vmatpush.msra.mxu1 %v280_v21 }
  0x24   : > { %329 = vmatpush.msra.mxu0 %v277_v22  ;;  %349 = vmatpush.msra.mxu1 %v278_v23 }
  0x26   : > { %330 = vmatpush.msra.mxu0 %v275_v24  ;;  %350 = vmatpush.msra.mxu1 %v276_v25 }
  0x28   : > { %331 = vmatpush.msra.mxu0 %v273_v26  ;;  %351 = vmatpush.msra.mxu1 %v274_v27 }
  0x29   : > { %553 = vmatmul.msk.f32.vlgmr.msra.gmra.mxu0 %vm305_vm1, %v272_v28  ;;  %555 = vmatmul.msk.f32.vlgmr.msra.gmra.mxu1 %vm305_vm1, %v272_v28 }
  0x69   : > { %v427_v12 = vpop.permute.xlu2 %426 }
  0x7f   : > { %v303_v29 = vpop.permute.xlu0 %302 }
  0xa6   : > { %v333_v30 = vpop.f32.mrf.mxu0  ;;  %v353_v31 = vpop.f32.mrf.mxu1 }
  0xa7   : > { %v334_v32 = vadd.f32 %v333_v30, %v303_v29  ;;  %v354_v33 = vadd.f32 %v353_v31, %v303_v29 }
  0xa9   : > { %v356_v34 = vadd.f32 %v354_v33, %v334_v32 }
  0xab   : > { %357 = vadd.xlane.f32.xlu0 %v356_v34 }
 0x11e   : > { %v358_v39 = vpop.xlane.xlu0 %357 }
 0x11f   : > { %v359_v40 = vrot.slane %v358_v39, 4 }
 0x121   : > { %v360_v41 = vadd.f32 %v359_v40, %v358_v39  ;;  %v432_v39 = vld [vmem:[%s266_s23 + $0x8] sm:$0xff] }
 0x123   : > { %v361_v43 = vrot.slane %v360_v41, 2 }
 0x125   : > { %v362_v44 = vadd.f32 %v361_v43, %v360_v41 }
 0x127   : > { %v363_v46 = vrot.slane %v362_v44, 1 }
 0x129   : > { %v364_v47 = vadd.f32 %v363_v46, %v362_v44 }
 0x12b   : > { %563 = vpush %v364_v47 }
 0x12c   : > { %565 = vpush %v372_v48 }
 0x15c   : > { %s564_s7 = spop %563 }
 0x15d   : > { %s566_s8 = spop %565 }
 0x15e   : > { %s374_s9 = smul.f32 %s566_s8, %s564_s7 }
 0x160   : > { %v375_v49 = vstv %s374_s9 }
 0x161   : > { %v376_v50 = vsub.f32 %v334_v32, %v375_v49  ;;  %v377_v51 = vsub.f32 %v354_v33, %v375_v49 }
 0x163   : > { %v378_v52 = vmul.f32 %v376_v50, %v376_v50  ;;  %v379_v53 = vmul.f32 %v377_v51, %v377_v51 }
 0x165   : > { %v380_v54 = vadd.f32 %v379_v53, %v378_v52 }
 0x167   : > { %381 = vadd.xlane.f32.xlu1 %v380_v54 }
 0x180   : > { %418 = vperm.xlu1 %582, %v415_v55  }
 0x1da   : > { %v382_v57 = vpop.xlane.xlu1 %381 }
 0x1db   : > { %v383_v58 = vrot.slane %v382_v57, 4 }
 0x1dd   : > { %v384_v59 = vadd.f32 %v383_v58, %v382_v57 }
 0x1df   : > { %v385_v60 = vrot.slane %v384_v59, 2 }
 0x1e1   : > { %v386_v61 = vadd.f32 %v385_v60, %v384_v59 }
 0x1e3   : > { %v387_v62 = vrot.slane %v386_v61, 1 }
 0x1e5   : > { %v388_v63 = vadd.f32 %v387_v62, %v386_v61 }
 0x1e7   : > { %567 = vpush %v388_v63 }
 0x1f2   : > { %v419_v9 = vpop.permute.xlu1 %418 }
 0x218   : > { %s568_s14 = spop %567 }
 0x219   : > { %s398_s15 = smul.f32 %s568_s14, %s566_s8 }
 0x21b   : > { %s399_s16 = sadd.f32 1e-08, %s398_s15 }
 0x21d   : > { %v400_v0 = vstv %s399_s16 }
 0x21e   : > { %586 = vrsqrt.f32 %v400_v0  ;;  %vm407_vm4 = vweird.f32 %v400_v0 }
 0x224   : > { %v587_v1 = vpop.eup %586 }
 0x225   : > { %v402_v2 = vmul.f32 %v587_v1, %v400_v0  ;;  %vm408_vm3 = vweird.f32 %v587_v1 }
 0x226   : > { %vm409_vm5 = vmor %vm407_vm4, %vm408_vm3 }
 0x227   : > { %v403_v3 = vmul.f32 %v587_v1, %v402_v2 }
 0x229   : > { %v404_v4 = vmul.f32 0.5, %v403_v3 }
 0x22b   : > { %v405_v5 = vsub.f32 1.5, %v404_v4 }
 0x22d   : > { %v406_v6 = vmul.f32 %v587_v1, %v405_v5 }
 0x22f   : > { %v410_v7 = vsel %vm409_vm5, %v587_v1, %v406_v6 }
 0x230   : > { %569 = vpush %v410_v7 }
 0x261   : > { %s570_s17 = spop %569 }
 0x262   : > { %v412_v8 = vstv %s570_s17 }
 0x263   : > { %v413_v10 = vmul.f32 %v412_v8, %v376_v50  ;;  %v414_v11 = vmul.f32 %v412_v8, %v377_v51 }
 0x265   : > { %v421_v13 = vmul.f32 %v419_v9, %v413_v10  ;;  %v422_v14 = vmul.f32 %v419_v9, %v414_v11 }
 0x267   : > { %v429_v15 = vadd.f32 %v427_v12, %v421_v13  ;;  %v430_v16 = vadd.f32 %v427_v12, %v422_v14 }
 0x269   : > { %v556_v17 = vmul.f32 -1.442695, %v429_v15  ;;  %v557_v18 = vmul.f32 -1.442695, %v430_v16 }
 0x26b   : > { %588 = vpow2.f32 %v556_v17 }
 0x26c   : > { %590 = vpow2.f32 %v557_v18 }
 0x271   : > { %v589_v19 = vpop.eup %588 }
 0x272   : > { %v591_v20 = vpop.eup %590  ;;  %v439_v21 = vadd.f32 1.0, %v589_v19 }
 0x273   : > { %v440_v22 = vadd.f32 1.0, %v591_v20 }
 0x274   : > { %592 = vrcp.f32 %v439_v21  ;;  %v452_v28 = vand.u32 2147483648, %v439_v21  ;;  %v450_v31 = vand.u32 2147483647, %v439_v21  ;;  %vm446_vm8 = vweird.f32 %v439_v21 }
 0x275   : > { %594 = vrcp.f32 %v440_v22  ;;  %v467_v32 = vand.u32 2147483648, %v440_v22  ;;  %v465_v34 = vand.u32 2147483647, %v440_v22  ;;  %vm461_vm10 = vweird.f32 %v440_v22 }
 0x276   : > { %v453_v37 = vor.u32 1.1754944e-38, %v452_v28  ;;  %vm451_vm11 = vcmp.eq.f32.partialorder %v450_v31, 8.507059e+37 }
 0x277   : > { %v468_v41 = vor.u32 1.1754944e-38, %v467_v32  ;;  %vm466_vm13 = vcmp.eq.f32.partialorder %v465_v34, 8.507059e+37 }
 0x27a   : > { %v593_v23 = vpop.eup %592 }
 0x27b   : > { %v595_v24 = vpop.eup %594  ;;  %v442_v25 = vmul.f32 %v593_v23, %v439_v21  ;;  %vm447_vm6 = vweird.f32 %v593_v23 }
 0x27c   : > { %v457_v26 = vmul.f32 %v595_v24, %v440_v22  ;;  %vm462_vm7 = vweird.f32 %v595_v24  ;;  %vm448_vm9 = vmor %vm446_vm8, %vm447_vm6 }
 0x27d   : > { %v443_v27 = vsub.f32 1.0, %v442_v25  ;;  %vm463_vm12 = vmor %vm461_vm10, %vm462_vm7 }
 0x27e   : > { %v458_v29 = vsub.f32 1.0, %v457_v26 }
 0x27f   : > { %v444_v30 = vmul.f32 %v593_v23, %v443_v27 }
 0x280   : > { %v459_v33 = vmul.f32 %v595_v24, %v458_v29 }
 0x281   : > { %v445_v35 = vadd.f32 %v593_v23, %v444_v30 }
 0x282   : > { %v460_v38 = vadd.f32 %v595_v24, %v459_v33 }
 0x283   : > { %v449_v40 = vsel %vm448_vm9, %v593_v23, %v445_v35 }
 0x284   : > { %v454_v42 = vsel %vm451_vm11, %v453_v37, %v449_v40  ;;  %v464_v43 = vsel %vm463_vm12, %v595_v24, %v460_v38 }
 0x285   : > { %v469_v44 = vsel %vm466_vm13, %v468_v41, %v464_v43  ;;  %v471_v45 = vmul.f32 %v454_v42, %v431_v36 }
 0x286   : > { %v472_v46 = vmul.f32 %v469_v44, %v432_v39 }
 0x287   : > { %473 = vst [vmem:[%s271_s25] sm:$0xff] %v471_v45 }
 0x288   : > { %474 = vst [vmem:[%s271_s25 + $0x8] sm:$0xff] %v472_v46 }
 0x289 PF: > { %s16_s21 = sadd.s32 1, %s602_s21  }
 0x28a   : > { %p13_p4 = scmp.ge.s32.totalorder %s16_s21, 4  }
 0x28c   :  { %15 = sbr.rel (!%p13_p4) target bundleno = 1 (0x1), region = 77 }

// kernel: fc_forward.4
= control target key start
LH: loop header
LB: loop body
LE: loop exit
PB: predicated region body
PF: predicated region fallthrough
CT: control target
= control target key end

     0   :  { %s530_s15 = smov 0   ;;  %s532_s16 = smov 0   ;;  %s582_s0 = inlined_call_operand.vmem [shape: f32[2,8,256], index: 0, kind: input, shape index: {}]   ;;  %s583_s1 = inlined_call_operand.vmem [shape: f32[16,8], index: 1, kind: input, shape index: {}]   ;;  %s584_s2 = inlined_call_operand.vmem [shape: f32[16,1], index: 2, kind: input, shape index: {}]   ;;  %s585_s3 = inlined_call_operand.vmem [shape: f32[2,8,1], index: 3, kind: output, shape index: {0}]   ;;  %s586_s4 = inlined_call_operand.vmem [shape: f32[2,8,1], index: 4, kind: output, shape index: {1}]  }
   0x1   :  { %s534_s17 = smov 0  }
   0x2 LB: > { %s27_s18 = sadd.s32 1, %s497_s16  ;;  %p438_p0 = scmp.ge.s32.totalorder %s501_s17, 1  ;;  %s501_s17 = sphi %s534_s17, %s15_s17   ;;  %s497_s16 = sphi %s532_s16, %s588_s16   ;;  %s493_s15 = sphi %s530_s15, %s587_s15  }
   0x3   : > { %p29_p1 = scmp.ge.s32.totalorder %s27_s18, 2  ;;  %p184_p2 = scmp.lt.s32.totalorder %s501_s17, 3 }
   0x5   : > { %s590_s18 = smov (%p29_p1, %s27_s18), 0  ;;  %p185_p3 = pnand %p438_p0, %p184_p2 }
   0x6   : > { %p218_p4 = scmp.lt.s32.totalorder (!%p185_p3), %s493_s15, 1 }
   0x7   : > { %188 = sbr.rel (%p185_p3) target bundleno = 280 (0x118), region = 32 }
   0xc   : > { %v246_v0 = vld [vmem:[%s584_s2] sm:$0xff]  ;;  %v503_v1 = vmov 0   ;;  %s592_s15 = smov (!%p218_p4, %s493_s15), 1  ;;  %vm258_vm0 = vcmask 64512   ;;  %v243_v5 = vld [vmem:[%s583_s1 + $0x8] sm:$0xff]  ;;  %vm239_vm1 = vcmask 7168  }
   0xd   : > { %478 = vset.pattern.permute.xlu0 %v503_v1  ;;  %s449_s21 = sshll.u32 %s592_s15, 4  ;;  %v242_v2 = vld [vmem:[%s583_s1] sm:$0xff]  ;;  %v247_v6 = vld [vmem:[%s584_s2 + $0x8] sm:$0xff]  ;;  %s441_s5 = sshll.u32 %s592_s15, 3  ;;  %v504_v25 = vmov 0.0  }
   0xe   : > { %250 = vperm.xlu0 %478, %v246_v0   ;;  %s225_s24 = scalar_lea.vmem %s582_s0, %s449_s21  ;;  %s230_s8 = scalar_lea.vmem %s585_s3, %s441_s5 }
   0xf   : > { %v244_v3 = vld [vmem:[%s225_s24] sm:$0xff]  ;;  %v245_v4 = vld [vmem:[%s225_s24 + $0x8] sm:$0xff]  ;;  %s234_s11 = scalar_lea.vmem %s586_s4, %s441_s5  ;;  %240 = vst.msk [vmem:[%s230_s8] sm:$0xff] %vm239_vm1, %v504_v25 }
  0x10   : > { %280 = vmatpush.msra.mxu0 %v244_v3  ;;  %450 = vmatpush.msra.mxu2 %v244_v3  ;;  %241 = vst.msk [vmem:[%s234_s11] sm:$0xff] %vm239_vm1, %v504_v25 }
  0x11   : > { %303 = vmatpush.msra.mxu1 %v245_v4  ;;  %451 = vmatpush.msra.mxu3 %v245_v4 }
  0x12   : > { %443 = vmatmul.msk.f32.vlgmr.msra.gmra.mxu0 %vm258_vm0, %v242_v2  ;;  %444 = vmatmul.msk.f32.vlgmr.msra.gmra.mxu2 %vm258_vm0, %v243_v5 }
  0x13   : > { %445 = vmatmul.msk.f32.vlgmr.msra.gmra.mxu1 %vm258_vm0, %v242_v2  ;;  %446 = vmatmul.msk.f32.vlgmr.msra.gmra.mxu3 %vm258_vm0, %v243_v5 }
  0x16   : > { %255 = vperm.xlu0 %478, %v247_v6   ;;  %v311_v28 = vld [vmem:[%s230_s8] sm:$0xff] }
  0x17   : > { %v322_v31 = vld [vmem:[%s234_s11] sm:$0xff] }
  0x80   : > { %v251_v7 = vpop.permute.xlu0 %250 }
  0x88   : > { %v256_v15 = vpop.permute.xlu0 %255 }
  0x8f   : > { %v282_v8 = vpop.f32.mrf.mxu0 }
  0x90   : > { %v283_v9 = vadd.f32 %v282_v8, %v251_v7  ;;  %v305_v10 = vpop.f32.mrf.mxu1 }
  0x91   : > { %v306_v11 = vadd.f32 %v305_v10, %v251_v7 }
  0x92   : > { %v323_v12 = vmul.f32 %v283_v9, %v283_v9 }
  0x93   : > { %v312_v13 = vadd.f32 %v306_v11, %v283_v9  ;;  %v324_v14 = vmul.f32 %v306_v11, %v306_v11 }
  0x95   : > { %313 = vadd.xlane.f32.xlu1 %v312_v13  ;;  %v285_v16 = vpop.f32.mrf.mxu2  ;;  %v325_v17 = vadd.f32 %v324_v14, %v323_v12 }
  0x96   : > { %v286_v18 = vadd.f32 %v285_v16, %v256_v15  ;;  %v308_v19 = vpop.f32.mrf.mxu3 }
  0x97   : > { %v309_v20 = vadd.f32 %v308_v19, %v256_v15  ;;  %326 = vadd.xlane.f32.xlu2 %v325_v17 }
  0x98   : > { %v328_v21 = vmul.f32 %v286_v18, %v286_v18 }
  0x99   : > { %v329_v22 = vmul.f32 %v309_v20, %v309_v20  ;;  %v315_v23 = vadd.f32 %v309_v20, %v286_v18 }
  0x9b   : > { %v330_v24 = vadd.f32 %v329_v22, %v328_v21 }
  0x9d   : > { %316 = vadd.xlane.f32.xlu1 %v315_v23 }
  0x9f   : > { %331 = vadd.xlane.f32.xlu2 %v330_v24 }
 0x108   : > { %v314_v26 = vpop.xlane.xlu1 %313 }
 0x10a   : > { %v327_v27 = vpop.xlane.xlu2 %326 }
 0x110   : > { %v317_v29 = vpop.xlane.xlu1 %316 }
 0x111   : > { %v318_v30 = vadd.f32 %v317_v29, %v314_v26 }
 0x112   : > { %v332_v32 = vpop.xlane.xlu2 %331 }
 0x113   : > { %v319_v33 = vadd.f32 %v318_v30, %v311_v28  ;;  %v333_v34 = vadd.f32 %v332_v32, %v327_v27 }
 0x115   : > { %321 = vst.msk [vmem:[%s230_s8] sm:$0xff] %vm239_vm1, %v319_v33  ;;  %v334_v35 = vadd.f32 %v333_v34, %v322_v31 }
 0x117   : > { %335 = vst.msk [vmem:[%s234_s11] sm:$0xff] %vm239_vm1, %v334_v35 }
 0x118 PF: > { %s15_s17 = sadd.s32 1, %s501_s17   ;;  %s587_s15 = smov %s497_s16 }
 0x119   : > { %p12_p5 = scmp.ge.s32.totalorder %s15_s17, 4   ;;  %s588_s16 = smov %s590_s18 }
 0x11b   :  { %14 = sbr.rel (!%p12_p5) target bundleno = 2 (0x2), region = 78 }

// kernel: fc_forward.5
= control target key start
LH: loop header
LB: loop body
LE: loop exit
PB: predicated region body
PF: predicated region fallthrough
CT: control target
= control target key end

     0   :  { %s793_s24 = smov 0   ;;  %s795_s25 = smov 0   ;;  %s860_s0 = inlined_call_operand.vmem [shape: f32[2,8,256], index: 0, kind: input, shape index: {}]   ;;  %s861_s1 = inlined_call_operand.vmem [shape: f32[16,8], index: 1, kind: input, shape index: {}]   ;;  %s862_s2 = inlined_call_operand.vmem [shape: f32[16,1], index: 2, kind: input, shape index: {}]   ;;  %s863_s3 = inlined_call_operand.vmem [shape: f32[2,16,1], index: 3, kind: input, shape index: {}]   ;;  %s864_s4 = inlined_call_operand.vmem [shape: f32[2,16,1], index: 4, kind: input, shape index: {}]   ;;  %s865_s5 = inlined_call_operand.vmem [shape: f32[16,1], index: 5, kind: input, shape index: {}]   ;;  %s866_s6 = inlined_call_operand.vmem [shape: f32[2,8,256], index: 6, kind: output, shape index: {0}]   ;;  %s867_s7 = inlined_call_operand.vmem [shape: f32[2,8,256], index: 7, kind: output, shape index: {1}]  }
   0x1   :  { %s797_s26 = smov 0  }
   0x2 LB: > { %s30_s27 = sadd.s32 1, %s746_s25  ;;  %p676_p0 = scmp.ge.s32.totalorder %s750_s26, 1  ;;  %s750_s26 = sphi %s797_s26, %s18_s26   ;;  %s746_s25 = sphi %s795_s25, %s869_s25   ;;  %s742_s24 = sphi %s793_s24, %s868_s24  }
   0x3   : > { %p32_p1 = scmp.ge.s32.totalorder %s30_s27, 2  ;;  %p283_p2 = scmp.lt.s32.totalorder %s750_s26, 3 }
   0x5   : > { %s871_s27 = smov (%p32_p1, %s30_s27), 0  ;;  %p284_p3 = pnand %p676_p0, %p283_p2 }
   0x6   : > { %p343_p4 = scmp.lt.s32.totalorder (!%p284_p3), %s742_s24, 1 }
   0x7   : > { %287 = sbr.rel (%p284_p3) target bundleno = 162 (0xa2), region = 44 }
   0xc   : > { %v386_v0 = vld [vmem:[%s862_s2] sm:$0xff]  ;;  %v752_v1 = vmov 0   ;;  %s873_s24 = smov (!%p343_p4, %s742_s24), 1  ;;  %vm398_vm0 = vcmask 64512   ;;  %v383_v6 = vld [vmem:[%s861_s1 + $0x8] sm:$0xff] }
   0xd   : > { %725 = vset.pattern.permute.xlu0 %v752_v1  ;;  %726 = vset.pattern.permute.xlu1 %v752_v1  ;;  %s814_s30 = sshll.u32 %s873_s24, 4  ;;  %v382_v2 = vld [vmem:[%s861_s1] sm:$0xff]  ;;  %v387_v7 = vld [vmem:[%s862_s2 + $0x8] sm:$0xff] }
   0xe   : > { %390 = vperm.xlu0 %725, %v386_v0   ;;  %727 = vset.pattern.permute.xlu2 %v752_v1  ;;  %s356_s10 = scalar_lea.vmem %s863_s3, %s814_s30  ;;  %s350_s13 = scalar_lea.vmem %s860_s0, %s814_s30  ;;  %v487_v10 = vld [vmem:[%s865_s5] sm:$0xff]  ;;  %v488_v12 = vld [vmem:[%s865_s5 + $0x8] sm:$0xff] }
   0xf   : > { %v451_v3 = vld [vmem:[%s356_s10] sm:$0xff]  ;;  %v385_v5 = vld [vmem:[%s350_s13 + $0x8] sm:$0xff]  ;;  %s361_s18 = scalar_lea.vmem %s864_s4, %s814_s30 }
  0x10   : > { %v384_v4 = vld [vmem:[%s350_s13] sm:$0xff]  ;;  %455 = vperm.xlu1 %726, %v451_v3   ;;  %443 = vmatpush.msra.mxu1 %v385_v5  ;;  %v452_v9 = vld [vmem:[%s356_s10 + $0x8] sm:$0xff]  ;;  %s370_s10 = scalar_lea.vmem %s866_s6, %s814_s30  ;;  %s380_s13 = scalar_lea.vmem %s867_s7, %s814_s30 }
  0x11   : > { %420 = vmatpush.msra.mxu0 %v384_v4  ;;  %698 = vmatpush.msra.mxu2 %v384_v4  ;;  %v467_v8 = vld [vmem:[%s361_s18] sm:$0xff]  ;;  %v468_v11 = vld [vmem:[%s361_s18 + $0x8] sm:$0xff] }
  0x12   : > { %699 = vmatpush.msra.mxu3 %v385_v5  ;;  %687 = vmatmul.msk.f32.vlgmr.msra.gmra.mxu0 %vm398_vm0, %v382_v2 }
  0x13   : > { %688 = vmatmul.msk.f32.vlgmr.msra.gmra.mxu2 %vm398_vm0, %v383_v6  ;;  %689 = vmatmul.msk.f32.vlgmr.msra.gmra.mxu1 %vm398_vm0, %v382_v2 }
  0x14   : > { %690 = vmatmul.msk.f32.vlgmr.msra.gmra.mxu3 %vm398_vm0, %v383_v6  ;;  %471 = vperm.xlu2 %727, %v467_v8  }
  0x16   : > { %395 = vperm.xlu0 %725, %v387_v7  }
  0x18   : > { %460 = vperm.xlu1 %726, %v452_v9  }
  0x1c   : > { %476 = vperm.xlu2 %727, %v468_v11  }
  0x1e   : > { %491 = vperm.xlu0 %725, %v487_v10  }
  0x20   : > { %496 = vperm.xlu1 %726, %v488_v12  }
  0x6e   : > { %v472_v17 = vpop.permute.xlu2 %471 }
  0x76   : > { %v477_v36 = vpop.permute.xlu2 %476 }
  0x80   : > { %v391_v13 = vpop.permute.xlu0 %390 }
  0x82   : > { %v456_v14 = vpop.permute.xlu1 %455 }
  0x88   : > { %v396_v15 = vpop.permute.xlu0 %395 }
  0x8a   : > { %v461_v21 = vpop.permute.xlu1 %460 }
  0x8f   : > { %v422_v16 = vpop.f32.mrf.mxu0 }
  0x90   : > { %v423_v18 = vadd.f32 %v422_v16, %v391_v13  ;;  %v445_v19 = vpop.f32.mrf.mxu1  ;;  %v492_v25 = vpop.permute.xlu0 %491 }
  0x91   : > { %v446_v20 = vadd.f32 %v445_v19, %v391_v13 }
  0x92   : > { %v463_v22 = vmul.f32 %v456_v14, %v423_v18  ;;  %v497_v39 = vpop.permute.xlu1 %496 }
  0x93   : > { %v464_v23 = vmul.f32 %v456_v14, %v446_v20 }
  0x94   : > { %v479_v24 = vadd.f32 %v472_v17, %v463_v22 }
  0x95   : > { %v480_v26 = vadd.f32 %v472_v17, %v464_v23 }
  0x96   : > { %vm483_vm1 = vcmp.ge.f32.partialorder %v479_v24, 0.0  ;;  %v499_v27 = vmul.f32 %v492_v25, %v479_v24  ;;  %v425_v28 = vpop.f32.mrf.mxu2 }
  0x97   : > { %vm484_vm2 = vcmp.ge.f32.partialorder %v480_v26, 0.0  ;;  %v500_v29 = vmul.f32 %v492_v25, %v480_v26  ;;  %v426_v30 = vadd.f32 %v425_v28, %v396_v15  ;;  %v448_v31 = vpop.f32.mrf.mxu3 }
  0x98   : > { %v503_v32 = vsel %vm483_vm1, %v479_v24, %v499_v27  ;;  %v449_v33 = vadd.f32 %v448_v31, %v396_v15 }
  0x99   : > { %507 = vst [vmem:[%s370_s10] sm:$0xff] %v503_v32  ;;  %v504_v34 = vsel %vm484_vm2, %v480_v26, %v500_v29  ;;  %v465_v35 = vmul.f32 %v461_v21, %v426_v30 }
  0x9a   : > { %508 = vst [vmem:[%s370_s10 + $0x8] sm:$0xff] %v504_v34  ;;  %v466_v37 = vmul.f32 %v461_v21, %v449_v33 }
  0x9b   : > { %v481_v38 = vadd.f32 %v477_v36, %v465_v35 }
  0x9c   : > { %v482_v40 = vadd.f32 %v477_v36, %v466_v37 }
  0x9d   : > { %vm485_vm3 = vcmp.ge.f32.partialorder %v481_v38, 0.0  ;;  %v501_v41 = vmul.f32 %v497_v39, %v481_v38 }
  0x9e   : > { %vm486_vm4 = vcmp.ge.f32.partialorder %v482_v40, 0.0  ;;  %v502_v42 = vmul.f32 %v497_v39, %v482_v40 }
  0x9f   : > { %v505_v43 = vsel %vm485_vm3, %v481_v38, %v501_v41 }
  0xa0   : > { %509 = vst [vmem:[%s380_s13] sm:$0xff] %v505_v43  ;;  %v506_v44 = vsel %vm486_vm4, %v482_v40, %v502_v42 }
  0xa1   : > { %510 = vst [vmem:[%s380_s13 + $0x8] sm:$0xff] %v506_v44 }
  0xa2 PF: > { %s18_s26 = sadd.s32 1, %s750_s26   ;;  %s868_s24 = smov %s746_s25 }
  0xa3   : > { %p15_p5 = scmp.ge.s32.totalorder %s18_s26, 4   ;;  %s869_s25 = smov %s871_s27 }
  0xa5   :  { %17 = sbr.rel (!%p15_p5) target bundleno = 2 (0x2), region = 92 }

</bundles_post_ra>
